<compile_context>
chip_gen: v7x
topology: tpu7x:2x2x1
jax: 0.10.0
libtpu: 0.0.40
codegen_flags: <defaults>
</compile_context>

<pallas_src>
import functools

import jax
import jax.numpy as jnp
from jax import lax
from jax.experimental import pallas as pl
from jax.experimental.pallas import tpu as pltpu


C_PAD = 128   # lane-dense padded class dimension


def _round_up(v, m):
    return pl.cdiv(v, m) * m


def _layer1_kernel(adj_ref, xw1_ref, b1_ref, scale_ref, w2p_ref,
                   p2_ref, acc_ref, *, tile_k):
    """p2[tile_i] = dropout(relu((A_hat @ xw1)[tile_i] + b1)) @ W2_pad."""
    k = pl.program_id(1)

    @pl.when(k == 0)
    def _():
        acc_ref[...] = jnp.zeros_like(acc_ref)

    # Stream the bf16 adjacency tile against the VMEM-resident xw1 slab.
    acc_ref[...] += jnp.dot(adj_ref[...],
                            xw1_ref[pl.ds(k * tile_k, tile_k), :],
                            preferred_element_type=jnp.float32)

    @pl.when(k == pl.num_programs(1) - 1)
    def _():
        h1 = jnp.maximum(acc_ref[...] + b1_ref[...], 0.0)
        h1 = h1 * scale_ref[...]                       # inverted dropout
        # Fused layer-2 projection: (A @ h1) @ W2 == A @ (h1 @ W2).
        p2 = jnp.dot(h1.astype(jnp.bfloat16), w2p_ref[...],
                     preferred_element_type=jnp.float32)
        p2_ref[...] = p2.astype(p2_ref.dtype)


def _layer2_kernel(adj_ref, p2_ref, b2p_ref, out_ref, *, tile_k, num_classes):
    """out[tile_i] = softmax((A_hat @ p2)[tile_i] + b2) over real class lanes."""
    k = pl.program_id(1)

    @pl.when(k == 0)
    def _():
        out_ref[...] = jnp.zeros_like(out_ref)

    # Accumulate directly into the resident f32 output block (no acc scratch).
    out_ref[...] += jnp.dot(adj_ref[...],
                            p2_ref[pl.ds(k * tile_k, tile_k), :],
                            preferred_element_type=jnp.float32)

    @pl.when(k == pl.num_programs(1) - 1)
    def _():
        logits = out_ref[...] + b2p_ref[...]
        col = lax.broadcasted_iota(jnp.int32, logits.shape, 1)
        logits = jnp.where(col < num_classes, logits, -jnp.inf)
        m = jnp.max(logits, axis=1, keepdims=True)
        e = jnp.exp(logits - m)
        denom = jnp.sum(e, axis=1, keepdims=True)
        out_ref[...] = e / denom      # exact divide: runs once per row tile


def _tile_plan(n):
    """Row/contraction tiles and padded N (tiny-N fast path: one block)."""
    if n <= 512:
        n_pad = int(_round_up(n, 128))
        return n_pad, n_pad, n_pad
    n_pad = int(_round_up(n, 512))
    return n_pad, 256, 512


def _vmem_limit_bytes(n_pad, tile_row, tile_k, nhid):
    est = (
        2 * tile_row * tile_k * 2            # double-buffered bf16 adjacency tiles
        + n_pad * nhid * 2                   # resident xw1 (layer 1)
        + n_pad * C_PAD * 2                  # resident p2 (layer 2)
        + 2 * tile_row * nhid * 4            # dropout-scale blocks
        + 2 * tile_row * C_PAD * 4           # f32 output blocks (layer 2)
        + 2 * tile_row * C_PAD * 2           # bf16 p2 output blocks (layer 1)
        + tile_row * nhid * 4                # f32 accumulator scratch
        + 2 * (nhid * C_PAD * 2 + C_PAD * 4 + nhid * 4)   # small weight/bias blocks
    )
    # 2x headroom, floor 16 MiB, stay under v7x's 64 MiB physical VMEM.
    return int(min(max(2 * est, 16 * 1024 * 1024), 56 * 1024 * 1024))


def gcn_forward(x, a_hat, params, *, dropout_p, seed):
    """x: [N, F_in] f32, a_hat: [N, N] f32 symmetric-normalized adjacency."""
    n, _ = x.shape
    nhid = params["w1"].shape[1]
    num_classes = params["w2"].shape[1]

    n_pad, tile_row, tile_k = _tile_plan(n)
    if n_pad != n:
        a_hat = jnp.pad(a_hat, ((0, n_pad - n), (0, n_pad - n)))
        x = jnp.pad(x, ((0, n_pad - n), (0, 0)))

    adj_bf16 = a_hat.astype(jnp.bfloat16)

    # Layer-1 projection hoisted out of the kernel: A_hat @ (x @ W1).
    xw1 = (x @ params["w1"]).astype(jnp.bfloat16)                 # [n_pad, nhid]
    b1 = params["b1"].astype(jnp.float32)                          # [1, nhid]
    w2p = jnp.pad(params["w2"],
                  ((0, 0), (0, C_PAD - num_classes))).astype(jnp.bfloat16)
    b2p = jnp.pad(params["b2"],
                  ((0, 0), (0, C_PAD - num_classes))).astype(jnp.float32)

    # Wrapper-side inverted-dropout scale (exact F.dropout semantics).
    if dropout_p > 0.0:
        keep = jax.random.bernoulli(jax.random.PRNGKey(seed),
                                    1.0 - dropout_p, (n_pad, nhid))
        drop_scale = keep.astype(jnp.float32) * (1.0 / (1.0 - dropout_p))
    else:
        drop_scale = jnp.ones((n_pad, nhid), jnp.float32)

    grid = (n_pad // tile_row, n_pad // tile_k)
    cparams = pltpu.CompilerParams(
        dimension_semantics=("parallel", "arbitrary"),
        vmem_limit_bytes=_vmem_limit_bytes(n_pad, tile_row, tile_k, nhid))

    # ---- layer 1 aggregation + bias + relu + dropout + fused layer-2 proj ----
    p2 = pl.pallas_call(
        functools.partial(_layer1_kernel, tile_k=tile_k),
        out_shape=jax.ShapeDtypeStruct((n_pad, C_PAD), jnp.bfloat16),
        grid_spec=pltpu.PrefetchScalarGridSpec(
            num_scalar_prefetch=0,
            grid=grid,
            in_specs=[
                pl.BlockSpec((tile_row, tile_k), lambda i, k: (i, k)),   # adj
                pl.BlockSpec((n_pad, nhid), lambda i, k: (0, 0)),        # xw1 (resident)
                pl.BlockSpec((1, nhid), lambda i, k: (0, 0)),            # b1
                pl.BlockSpec((tile_row, nhid), lambda i, k: (i, 0)),     # dropout scale
                pl.BlockSpec((nhid, C_PAD), lambda i, k: (0, 0)),        # W2 pad (bf16)
            ],
            out_specs=pl.BlockSpec((tile_row, C_PAD), lambda i, k: (i, 0)),
            scratch_shapes=[pltpu.VMEM((tile_row, nhid), jnp.float32)]),
        compiler_params=cparams,
    )(adj_bf16, xw1, b1, drop_scale, w2p)

    # ---- layer 2 aggregation + bias + lane-dense masked softmax ----
    out_pad = pl.pallas_call(
        functools.partial(_layer2_kernel, tile_k=tile_k, num_classes=num_classes),
        out_shape=jax.ShapeDtypeStruct((n_pad, C_PAD), jnp.float32),
        grid_spec=pltpu.PrefetchScalarGridSpec(
            num_scalar_prefetch=0,
            grid=grid,
            in_specs=[
                pl.BlockSpec((tile_row, tile_k), lambda i, k: (i, k)),   # adj
                pl.BlockSpec((n_pad, C_PAD), lambda i, k: (0, 0)),       # p2 (resident)
                pl.BlockSpec((1, C_PAD), lambda i, k: (0, 0)),           # b2 pad
            ],
            out_specs=pl.BlockSpec((tile_row, C_PAD), lambda i, k: (i, 0))),
        compiler_params=cparams,
    )(adj_bf16, p2, b2p)

    return out_pad[:n, :num_classes]


def build_gcn_adjacency(edge_index, num_nodes):
    """Dense GCN-normalized adjacency: D^-1/2 (A + I) D^-1/2 (self-loops added)."""
    src, dst = edge_index[0], edge_index[1]
    a = jnp.zeros((num_nodes, num_nodes), jnp.float32)
    a = a.at[dst, src].add(1.0)
    a = a + jnp.eye(num_nodes, dtype=jnp.float32)
    deg = jnp.sum(a, axis=1)                      # >= 1 thanks to self-loops
    d_inv_sqrt = lax.rsqrt(deg)
    return d_inv_sqrt[:, None] * a * d_inv_sqrt[None, :]


def init_params(key, num_node_features, nhid, num_classes):
    ks = jax.random.split(key, 2)
    s1 = 1.0 / jnp.sqrt(float(num_node_features))
    s2 = 1.0 / jnp.sqrt(float(nhid))
    return {
        "w1": jax.random.uniform(ks[0], (num_node_features, nhid), jnp.float32, -s1, s1),
        "b1": jnp.zeros((1, nhid), jnp.float32),
        "w2": jax.random.uniform(ks[1], (nhid, num_classes), jnp.float32, -s2, s2),
        "b2": jnp.zeros((1, num_classes), jnp.float32),
    }


def gcn_reference(x, a_hat, params):
    """Pure-JAX reference (dropout disabled)."""
    h1 = jnp.maximum(a_hat @ x @ params["w1"] + params["b1"], 0.0)
    h2 = a_hat @ (h1 @ params["w2"]) + params["b2"]
    return jax.nn.softmax(h2, axis=1)


if __name__ == "__main__":
    num_nodes = 256
    num_node_features = 16
    nhid = 32
    num_classes = 4
    num_edges = 1024
    dropout_p = 0.5

    key = jax.random.PRNGKey(0)
    kx, ke, kp = jax.random.split(key, 3)

    x = jax.random.normal(kx, (num_nodes, num_node_features), jnp.float32)
    edge_index = jax.random.randint(ke, (2, num_edges), 0, num_nodes, jnp.int32)
    adj = build_gcn_adjacency(edge_index, num_nodes)
    params = init_params(kp, num_node_features, nhid, num_classes)

    # Eval-mode (dropout off) check against a pure-JAX reference (bf16 tolerance).
    out_eval = jax.block_until_ready(
        gcn_forward(x, adj, params, dropout_p=0.0, seed=0))
    ref = gcn_reference(x, adj, params)
    assert out_eval.shape == (num_nodes, num_classes)
    assert bool(jnp.allclose(out_eval, ref, atol=3e-2, rtol=3e-2))

    # Training-mode forward (dropout active, wrapper-generated mask).
    out = jax.block_until_ready(
        gcn_forward(x, adj, params, dropout_p=dropout_p, seed=0))
    assert out.shape == (num_nodes, num_classes)
    assert bool(jnp.all(jnp.isfinite(out)))
    assert bool(jnp.allclose(out.sum(axis=1), 1.0, atol=5e-3))
    print("KERNEL_OK")
</pallas_src>

<mosaic_0001>
module attributes {stable_mosaic.version = 11 : i64} {
  func.func @_layer1_kernel(%arg0: i32, %arg1: i32, %arg2: memref<256x256xbf16, #tpu.memory_space<vmem>>, %arg3: memref<256x32xbf16, #tpu.memory_space<vmem>>, %arg4: memref<1x32xf32, #tpu.memory_space<vmem>>, %arg5: memref<256x32xf32, #tpu.memory_space<vmem>>, %arg6: memref<32x128xbf16, #tpu.memory_space<vmem>>, %arg7: memref<256x128xbf16, #tpu.memory_space<vmem>>, %arg8: memref<256x32xf32, #tpu.memory_space<vmem>>) attributes {dimension_semantics = [#tpu.dimension_semantics<parallel>, #tpu.dimension_semantics<arbitrary>], iteration_bounds = array<i64: 1, 1>, scalar_prefetch = 0 : i64, scratch_operands = 1 : i64, tpu.core_type = #tpu.core_type<tc>, window_params = [{transform_indices = @transform_0, window_bounds = array<i64: 256, 256>}, {pipeline_mode = #tpu.pipeline_mode<synchronous>, transform_indices = @transform_1, window_bounds = array<i64: 256, 32>}, {pipeline_mode = #tpu.pipeline_mode<synchronous>, transform_indices = @transform_2, window_bounds = array<i64: 1, 32>}, {transform_indices = @transform_3, window_bounds = array<i64: 256, 32>}, {pipeline_mode = #tpu.pipeline_mode<synchronous>, transform_indices = @transform_4, window_bounds = array<i64: 32, 128>}, {transform_indices = @transform_5, window_bounds = array<i64: 256, 128>}]} {
    %c0_i32 = arith.constant 0 : i32
    %0 = arith.cmpi eq, %arg1, %c0_i32 : i32
    %1 = arith.extui %0 : i1 to i32
    %c0_i32_0 = arith.constant 0 : i32
    %2 = arith.cmpi ne, %1, %c0_i32_0 : i32
    scf.if %2 {
      %cst_9 = arith.constant 0.000000e+00 : f32
      %14 = vector.broadcast %cst_9 : f32 to vector<256x32xf32>
      %c0_10 = arith.constant 0 : index
      %c0_11 = arith.constant 0 : index
      %15 = vector.load %arg8[%c0_10, %c0_11] : memref<256x32xf32, #tpu.memory_space<vmem>>, vector<256x32xf32>
      tpu.vector_store %arg8[%c0_10, %c0_11], %14 {strides = array<i32>} : memref<256x32xf32, #tpu.memory_space<vmem>>, vector<256x32xf32>,
    } else {
    }
    %c0 = arith.constant 0 : index
    %c0_1 = arith.constant 0 : index
    %3 = vector.load %arg8[%c0, %c0_1] : memref<256x32xf32, #tpu.memory_space<vmem>>, vector<256x32xf32>
    %c0_2 = arith.constant 0 : index
    %c0_3 = arith.constant 0 : index
    %4 = vector.load %arg2[%c0_2, %c0_3] : memref<256x256xbf16, #tpu.memory_space<vmem>>, vector<256x256xbf16>
    %c256_i32 = arith.constant 256 : i32
    %5 = arith.muli %arg1, %c256_i32 : i32
    %6 = arith.index_cast %5 : i32 to index
    %c0_4 = arith.constant 0 : index
    %7 = vector.load %arg3[%6, %c0_4] : memref<256x32xbf16, #tpu.memory_space<vmem>>, vector<256x32xbf16>
    %cst = arith.constant dense<0.000000e+00> : vector<256x32xf32>
    %8 = tpu.matmul %4, %7, %cst {dimension_numbers = #tpu.dot_dimension_numbers<[1], [0], [0], [1], [0, 0, 1, 1], [], []>} : vector<256x256xbf16>, vector<256x32xbf16>, vector<256x32xf32> -> vector<256x32xf32>
    %9 = arith.addf %3, %8 : vector<256x32xf32>
    %c0_5 = arith.constant 0 : index
    %c0_6 = arith.constant 0 : index
    %10 = vector.load %arg8[%c0_5, %c0_6] : memref<256x32xf32, #tpu.memory_space<vmem>>, vector<256x32xf32>
    tpu.vector_store %arg8[%c0_5, %c0_6], %9 {strides = array<i32>} : memref<256x32xf32, #tpu.memory_space<vmem>>, vector<256x32xf32>,
    %c0_i32_7 = arith.constant 0 : i32
    %11 = arith.cmpi eq, %arg1, %c0_i32_7 : i32
    %12 = arith.extui %11 : i1 to i32
    %c0_i32_8 = arith.constant 0 : i32
    %13 = arith.cmpi ne, %12, %c0_i32_8 : i32
    scf.if %13 {
      %c0_9 = arith.constant 0 : index
      %c0_10 = arith.constant 0 : index
      %14 = vector.load %arg8[%c0_9, %c0_10] : memref<256x32xf32, #tpu.memory_space<vmem>>, vector<256x32xf32>
      %c0_11 = arith.constant 0 : index
      %c0_12 = arith.constant 0 : index
      %15 = vector.load %arg4[%c0_11, %c0_12] : memref<1x32xf32, #tpu.memory_space<vmem>>, vector<1x32xf32>
      %16 = vector.broadcast %15 : vector<1x32xf32> to vector<256x32xf32>
      %17 = arith.addf %14, %16 : vector<256x32xf32>
      %cst_13 = arith.constant 0.000000e+00 : f32
      %18 = vector.broadcast %cst_13 : f32 to vector<256x32xf32>
      %19 = arith.maximumf %17, %18 : vector<256x32xf32>
      %c0_14 = arith.constant 0 : index
      %c0_15 = arith.constant 0 : index
      %20 = vector.load %arg5[%c0_14, %c0_15] : memref<256x32xf32, #tpu.memory_space<vmem>>, vector<256x32xf32>
      %21 = arith.mulf %19, %20 : vector<256x32xf32>
      %22 = arith.truncf %21 : vector<256x32xf32> to vector<256x32xbf16>
      %c0_16 = arith.constant 0 : index
      %c0_17 = arith.constant 0 : index
      %23 = vector.load %arg6[%c0_16, %c0_17] : memref<32x128xbf16, #tpu.memory_space<vmem>>, vector<32x128xbf16>
      %cst_18 = arith.constant dense<0.000000e+00> : vector<256x128xf32>
      %24 = tpu.matmul %22, %23, %cst_18 {dimension_numbers = #tpu.dot_dimension_numbers<[1], [0], [0], [1], [0, 0, 1, 1], [], []>} : vector<256x32xbf16>, vector<32x128xbf16>, vector<256x128xf32> -> vector<256x128xf32>
      %25 = arith.truncf %24 : vector<256x128xf32> to vector<256x128xbf16>
      %c0_19 = arith.constant 0 : index
      %c0_20 = arith.constant 0 : index
      %26 = vector.load %arg7[%c0_19, %c0_20] : memref<256x128xbf16, #tpu.memory_space<vmem>>, vector<256x128xbf16>
      tpu.vector_store %arg7[%c0_19, %c0_20], %25 {strides = array<i32>} : memref<256x128xbf16, #tpu.memory_space<vmem>>, vector<256x128xbf16>,
    } else {
    }
    return
  }
  func.func @transform_0(%arg0: i32, %arg1: i32) -> (i32, i32) {
    %c0_i32 = arith.constant 0 : i32
    return %arg0, %arg1 : i32, i32
  }
  func.func @transform_1(%arg0: i32, %arg1: i32) -> (i32, i32) {
    %c0_i32 = arith.constant 0 : i32
    %c0_i32_0 = arith.constant 0 : i32
    %c0_i32_1 = arith.constant 0 : i32
    return %c0_i32, %c0_i32_0 : i32, i32
  }
  func.func @transform_2(%arg0: i32, %arg1: i32) -> (i32, i32) {
    %c0_i32 = arith.constant 0 : i32
    %c0_i32_0 = arith.constant 0 : i32
    %c0_i32_1 = arith.constant 0 : i32
    return %c0_i32, %c0_i32_0 : i32, i32
  }
  func.func @transform_3(%arg0: i32, %arg1: i32) -> (i32, i32) {
    %c0_i32 = arith.constant 0 : i32
    %c0_i32_0 = arith.constant 0 : i32
    return %arg0, %c0_i32 : i32, i32
  }
  func.func @transform_4(%arg0: i32, %arg1: i32) -> (i32, i32) {
    %c0_i32 = arith.constant 0 : i32
    %c0_i32_0 = arith.constant 0 : i32
    %c0_i32_1 = arith.constant 0 : i32
    return %c0_i32, %c0_i32_0 : i32, i32
  }
  func.func @transform_5(%arg0: i32, %arg1: i32) -> (i32, i32) {
    %c0_i32 = arith.constant 0 : i32
    %c0_i32_0 = arith.constant 0 : i32
    return %arg0, %c0_i32 : i32, i32
  }
}

</mosaic_0001>

<bundles_post_ra>
// kernel: tpu_custom_call.1
= control target key start
LH: loop header
LB: loop body
LE: loop exit
PB: predicated region body
PF: predicated region fallthrough
CT: control target
= control target key end

     0   :  { %s2142_s0 = inlined_call_operand.vmem [shape: bf16[256,256], index: 0, kind: input, shape index: {}]   ;;  %s2143_s1 = inlined_call_operand.vmem [shape: bf16[256,32], index: 1, kind: input, shape index: {}]   ;;  %s2144_s2 = inlined_call_operand.vmem [shape: f32[1,32], index: 2, kind: input, shape index: {}]   ;;  %s2145_s3 = inlined_call_operand.vmem [shape: f32[256,32], index: 3, kind: input, shape index: {}]   ;;  %s2146_s4 = inlined_call_operand.vmem [shape: bf16[32,128], index: 4, kind: input, shape index: {}]   ;;  %s2147_s5 = inlined_call_operand.hbm [shape: bf16[256,128], index: 5, kind: output, shape index: {}]  }
   0x1   :  { %v1643_v0 = vld [vmem:[%s2143_s1 + $0x40] sm:$0xff]   ;;  %v1645_v2 = vld [vmem:[%s2143_s1 + $0x48] sm:$0xff]   ;;  %v1647_v4 = vld [vmem:[%s2143_s1 + $0x50] sm:$0xff]  }
   0x2   :  { %v1644_v1 = vld [vmem:[%s2143_s1] sm:$0xff]   ;;  %1457 = vmatprep.subr.bf16.mxu0 %v1643_v0  ;;  %1623 = vmatprep.subr.bf16.mxu1 %v1643_v0  ;;  %v1646_v3 = vld [vmem:[%s2143_s1 + $0x8] sm:$0xff]   ;;  %v1648_v5 = vld [vmem:[%s2143_s1 + $0x10] sm:$0xff]  }
   0x3   :  { %1458 = vmatpush3.bf16.msra.mxu0 %v1644_v1  ;;  %1631 = vmatpush3.bf16.msra.mxu1 %v1644_v1  ;;  %v1649_v6 = vld [vmem:[%s2143_s1 + $0x58] sm:$0xff]   ;;  %v1651_v8 = vld [vmem:[%s2143_s1 + $0x60] sm:$0xff]   ;;  %v1653_v10 = vld [vmem:[%s2143_s1 + $0x68] sm:$0xff]  }
   0x4   :  { %1459 = vmatprep.subr.bf16.mxu0 %v1645_v2  ;;  %1624 = vmatprep.subr.bf16.mxu1 %v1645_v2  ;;  %v1650_v7 = vld [vmem:[%s2143_s1 + $0x18] sm:$0xff]   ;;  %v1652_v9 = vld [vmem:[%s2143_s1 + $0x20] sm:$0xff]   ;;  %v1654_v12 = vld [vmem:[%s2143_s1 + $0x28] sm:$0xff]  }
   0x5   :  { %v1661_v11 = vld [vmem:[%s2142_s0 + $0x4] ss:$8 sps:$4 sm:$0xff]   ;;  %v1655_v13 = vld [vmem:[%s2143_s1 + $0x70] sm:$0xff]   ;;  %v1657_v15 = vld [vmem:[%s2143_s1 + $0x78] sm:$0xff]  }
   0x6   :  { %448 = vmatprep.mubr.bf16.mxu0 %v1661_v11  ;;  %v1656_v14 = vld [vmem:[%s2143_s1 + $0x30] sm:$0xff]   ;;  %v1658_v16 = vld [vmem:[%s2143_s1 + $0x38] sm:$0xff]   ;;  %v1659_v17 = vld [vmem:[%s2142_s0] ss:$8 sps:$4 sm:$0xff]  }
   0x7   :  { %1460 = vmatpush3.bf16.msra.mxu0 %v1646_v3  ;;  %1632 = vmatpush3.bf16.msra.mxu1 %v1646_v3  ;;  %v1691_v18 = vld [vmem:[%s2142_s0 + $0xc4] ss:$8 sps:$4 sm:$0xff]   ;;  %v1662_v19 = vld [vmem:[%s2142_s0 + $0x14] ss:$8 sps:$4 sm:$0xff]   ;;  %v1689_v20 = vld [vmem:[%s2142_s0 + $0xc0] ss:$8 sps:$4 sm:$0xff]  }
   0x8   :  { %1461 = vmatprep.subr.bf16.mxu0 %v1647_v4  ;;  %1625 = vmatprep.subr.bf16.mxu1 %v1647_v4  ;;  %v1695_v21 = vld [vmem:[%s2142_s0 + $0xd4] ss:$8 sps:$4 sm:$0xff]   ;;  %v1664_v22 = vld [vmem:[%s2142_s0 + $0x10] ss:$8 sps:$4 sm:$0xff]  }
   0x9   :  { %544 = vmatprep.mubr.bf16.mxu1 %v1691_v18 }
   0xb   :  { %1462 = vmatpush3.bf16.msra.mxu0 %v1648_v5  ;;  %1633 = vmatpush3.bf16.msra.mxu1 %v1648_v5 }
   0xc   :  { %1463 = vmatprep.subr.bf16.mxu0 %v1649_v6  ;;  %1626 = vmatprep.subr.bf16.mxu1 %v1649_v6 }
   0xf   :  { %1464 = vmatpush3.bf16.msra.mxu0 %v1650_v7  ;;  %1634 = vmatpush3.bf16.msra.mxu1 %v1650_v7 }
  0x10   :  { %1465 = vmatprep.subr.bf16.mxu0 %v1651_v8  ;;  %1627 = vmatprep.subr.bf16.mxu1 %v1651_v8 }
  0x13   :  { %1466 = vmatpush3.bf16.msra.mxu0 %v1652_v9  ;;  %1635 = vmatpush3.bf16.msra.mxu1 %v1652_v9 }
  0x14   :  { %1467 = vmatprep.subr.bf16.mxu0 %v1653_v10  ;;  %1628 = vmatprep.subr.bf16.mxu1 %v1653_v10 }
  0x17   :  { %1468 = vmatpush3.bf16.msra.mxu0 %v1654_v12  ;;  %1636 = vmatpush3.bf16.msra.mxu1 %v1654_v12 }
  0x18   :  { %1469 = vmatprep.subr.bf16.mxu0 %v1655_v13  ;;  %1629 = vmatprep.subr.bf16.mxu1 %v1655_v13 }
  0x1b   :  { %1470 = vmatpush3.bf16.msra.mxu0 %v1656_v14  ;;  %1637 = vmatpush3.bf16.msra.mxu1 %v1656_v14 }
  0x1c   :  { %1471 = vmatprep.subr.bf16.mxu0 %v1657_v15  ;;  %1630 = vmatprep.subr.bf16.mxu1 %v1657_v15 }
  0x1f   :  { %1472 = vmatpush3.bf16.msra.mxu0 %v1658_v16  ;;  %1638 = vmatpush3.bf16.msra.mxu1 %v1658_v16 }
  0x22   :  { %449 = vmatmul.mubr.bf16.vlgmr.msra.gmra.mrb[0].mxu0 %v1659_v17  ;;  %545 = vmatmul.mubr.bf16.vlgmr.msra.gmra.mrb[0].mxu1 %v1689_v20 }
  0x23   :  { %456 = vmatprep.mubr.bf16.mxu0 %v1662_v19  ;;  %552 = vmatprep.mubr.bf16.mxu1 %v1695_v21 }
  0x24   :  { %10 = vsyncpa [#allocation4], 0  ;;  %v1665_v23 = vld [vmem:[%s2142_s0 + $0x24] ss:$8 sps:$4 sm:$0xff]   ;;  %v1697_v24 = vld [vmem:[%s2142_s0 + $0xd0] ss:$8 sps:$4 sm:$0xff]  }
  0x25   :  { %v1701_v25 = vld [vmem:[%s2142_s0 + $0xe4] ss:$8 sps:$4 sm:$0xff]   ;;  %v1667_v26 = vld [vmem:[%s2142_s0 + $0x20] ss:$8 sps:$4 sm:$0xff]   ;;  %v1668_v27 = vld [vmem:[%s2142_s0 + $0x34] ss:$8 sps:$4 sm:$0xff]  }
  0x26   :  { %v1703_v28 = vld [vmem:[%s2142_s0 + $0xe0] ss:$8 sps:$4 sm:$0xff]   ;;  %v1704_v29 = vld [vmem:[%s2142_s0 + $0xf4] ss:$8 sps:$4 sm:$0xff]   ;;  %v1670_v30 = vld [vmem:[%s2142_s0 + $0x30] ss:$8 sps:$4 sm:$0xff]  }
  0x27   :  { %v1671_v31 = vld [vmem:[%s2142_s0 + $0x44] ss:$8 sps:$4 sm:$0xff]   ;;  %v1706_v32 = vld [vmem:[%s2142_s0 + $0xf0] ss:$8 sps:$4 sm:$0xff]   ;;  %v1673_v33 = vld [vmem:[%s2142_s0 + $0x40] ss:$8 sps:$4 sm:$0xff]  }
  0x28   :  { %v1674_v34 = vld [vmem:[%s2142_s0 + $0x54] ss:$8 sps:$4 sm:$0xff]   ;;  %v1676_v35 = vld [vmem:[%s2142_s0 + $0x50] ss:$8 sps:$4 sm:$0xff]   ;;  %v1677_v36 = vld [vmem:[%s2142_s0 + $0x64] ss:$8 sps:$4 sm:$0xff]  }
  0x29   :  { %v1679_v37 = vld [vmem:[%s2142_s0 + $0x60] ss:$8 sps:$4 sm:$0xff]   ;;  %v1680_v38 = vld [vmem:[%s2142_s0 + $0x74] ss:$8 sps:$4 sm:$0xff]   ;;  %v1682_v39 = vld [vmem:[%s2142_s0 + $0x70] ss:$8 sps:$4 sm:$0xff]  }
  0x2a   :  { %457 = vmatmul.mubr.bf16.gmra.mrb[4].mxu0 %v1664_v22  ;;  %553 = vmatmul.mubr.bf16.gmra.mrb[4].mxu1 %v1697_v24  ;;  %v1683_v40 = vld [vmem:[%s2142_s0 + $0x84] ss:$8 sps:$4 sm:$0xff]   ;;  %v1685_v41 = vld [vmem:[%s2142_s0 + $0x80] ss:$8 sps:$4 sm:$0xff]   ;;  %v1686_v42 = vld [vmem:[%s2142_s0 + $0x94] ss:$8 sps:$4 sm:$0xff]  }
  0x2b   :  { %464 = vmatprep.mubr.bf16.mxu0 %v1665_v23  ;;  %560 = vmatprep.mubr.bf16.mxu1 %v1701_v25  ;;  %v1688_v43 = vld [vmem:[%s2142_s0 + $0x90] ss:$8 sps:$4 sm:$0xff]   ;;  %v1692_v44 = vld [vmem:[%s2142_s0 + $0xa4] ss:$8 sps:$4 sm:$0xff]   ;;  %v1694_v45 = vld [vmem:[%s2142_s0 + $0xa0] ss:$8 sps:$4 sm:$0xff]  }
  0x2c   :  { %v1698_v46 = vld [vmem:[%s2142_s0 + $0xb4] ss:$8 sps:$4 sm:$0xff]   ;;  %vm26_vm0 = vcmask 261120   ;;  %v1733_v47 = vmov 0.0   ;;  %v1700_v48 = vld [vmem:[%s2142_s0 + $0xb0] ss:$8 sps:$4 sm:$0xff]  }
  0x2d   :  { %27 = vst.msk [vmem:[#allocation2] sm:$0xff] %vm26_vm0, %v1733_v47  ;;  %28 = vst.msk [vmem:[#allocation2 + $0x8] sm:$0xff] %vm26_vm0, %v1733_v47  ;;  %v1707_v49 = vld [vmem:[%s2146_s4] sm:$0xff]   ;;  %v1708_v50 = vld [vmem:[%s2146_s4 + $0x8] sm:$0xff]  }
  0x2e   :  { %29 = vst.msk [vmem:[#allocation2 + $0x10] sm:$0xff] %vm26_vm0, %v1733_v47  ;;  %30 = vst.msk [vmem:[#allocation2 + $0x18] sm:$0xff] %vm26_vm0, %v1733_v47  ;;  %1587 = vmatprep.subr.bf16.mxu1 %v1707_v49  ;;  %v1956_v17 = vld [vmem:[%s2144_s2] ss:$0 sm:$0xff] }
  0x2f   :  { %31 = vst.msk [vmem:[#allocation2 + $0x20] sm:$0xff] %vm26_vm0, %v1733_v47  ;;  %32 = vst.msk [vmem:[#allocation2 + $0x28] sm:$0xff] %vm26_vm0, %v1733_v47  ;;  %1588 = vmatpush3.bf16.msra.mxu1 %v1707_v49 }
  0x30   :  { %33 = vst.msk [vmem:[#allocation2 + $0x30] sm:$0xff] %vm26_vm0, %v1733_v47  ;;  %34 = vst.msk [vmem:[#allocation2 + $0x38] sm:$0xff] %vm26_vm0, %v1733_v47  ;;  %1589 = vmatprep.subr.bf16.mxu1 %v1708_v50 }
  0x31   :  { %35 = vst.msk [vmem:[#allocation2 + $0x40] sm:$0xff] %vm26_vm0, %v1733_v47  ;;  %36 = vst.msk [vmem:[#allocation2 + $0x48] sm:$0xff] %vm26_vm0, %v1733_v47 }
  0x32   :  { %465 = vmatmul.mubr.bf16.gmra.mrb[8].mxu0 %v1667_v26  ;;  %561 = vmatmul.mubr.bf16.gmra.mrb[8].mxu1 %v1703_v28  ;;  %37 = vst.msk [vmem:[#allocation2 + $0x50] sm:$0xff] %vm26_vm0, %v1733_v47  ;;  %38 = vst.msk [vmem:[#allocation2 + $0x58] sm:$0xff] %vm26_vm0, %v1733_v47 }
  0x33   :  { %472 = vmatprep.mubr.bf16.mxu0 %v1668_v27  ;;  %568 = vmatprep.mubr.bf16.mxu1 %v1704_v29  ;;  %39 = vst.msk [vmem:[#allocation2 + $0x60] sm:$0xff] %vm26_vm0, %v1733_v47  ;;  %40 = vst.msk [vmem:[#allocation2 + $0x68] sm:$0xff] %vm26_vm0, %v1733_v47 }
  0x34   :  { %41 = vst.msk [vmem:[#allocation2 + $0x70] sm:$0xff] %vm26_vm0, %v1733_v47  ;;  %42 = vst.msk [vmem:[#allocation2 + $0x78] sm:$0xff] %vm26_vm0, %v1733_v47  ;;  %1590 = vmatpush3.bf16.msra.mxu1 %v1708_v50  ;;  %v59_v52 = vld [vmem:[#allocation2] sm:$0xff]  ;;  %v60_v59 = vld [vmem:[#allocation2 + $0x8] sm:$0xff] }
  0x35   :  { %43 = vst.msk [vmem:[#allocation2 + $0x80] sm:$0xff] %vm26_vm0, %v1733_v47  ;;  %44 = vst.msk [vmem:[#allocation2 + $0x88] sm:$0xff] %vm26_vm0, %v1733_v47  ;;  %v61_v8 = vld [vmem:[#allocation2 + $0x10] sm:$0xff]  ;;  %v62_v15 = vld [vmem:[#allocation2 + $0x18] sm:$0xff] }
  0x36   :  { %45 = vst.msk [vmem:[#allocation2 + $0x90] sm:$0xff] %vm26_vm0, %v1733_v47  ;;  %46 = vst.msk [vmem:[#allocation2 + $0x98] sm:$0xff] %vm26_vm0, %v1733_v47 }
  0x37   :  { %47 = vst.msk [vmem:[#allocation2 + $0xa0] sm:$0xff] %vm26_vm0, %v1733_v47  ;;  %48 = vst.msk [vmem:[#allocation2 + $0xa8] sm:$0xff] %vm26_vm0, %v1733_v47 }
  0x38   :  { %49 = vst.msk [vmem:[#allocation2 + $0xb0] sm:$0xff] %vm26_vm0, %v1733_v47  ;;  %50 = vst.msk [vmem:[#allocation2 + $0xb8] sm:$0xff] %vm26_vm0, %v1733_v47 }
  0x39   :  { %51 = vst.msk [vmem:[#allocation2 + $0xc0] sm:$0xff] %vm26_vm0, %v1733_v47  ;;  %52 = vst.msk [vmem:[#allocation2 + $0xc8] sm:$0xff] %vm26_vm0, %v1733_v47 }
  0x3a   :  { %473 = vmatmul.mubr.bf16.gmra.mrb[12].mxu0 %v1670_v30  ;;  %569 = vmatmul.mubr.bf16.gmra.mrb[12].mxu1 %v1706_v32  ;;  %53 = vst.msk [vmem:[#allocation2 + $0xd0] sm:$0xff] %vm26_vm0, %v1733_v47  ;;  %54 = vst.msk [vmem:[#allocation2 + $0xd8] sm:$0xff] %vm26_vm0, %v1733_v47 }
  0x3b   :  { %480 = vmatprep.mubr.bf16.mxu0 %v1671_v31  ;;  %55 = vst.msk [vmem:[#allocation2 + $0xe0] sm:$0xff] %vm26_vm0, %v1733_v47  ;;  %56 = vst.msk [vmem:[#allocation2 + $0xe8] sm:$0xff] %vm26_vm0, %v1733_v47 }
  0x3c   :  { %57 = vst.msk [vmem:[#allocation2 + $0xf0] sm:$0xff] %vm26_vm0, %v1733_v47  ;;  %58 = vst.msk [vmem:[#allocation2 + $0xf8] sm:$0xff] %vm26_vm0, %v1733_v47 }
  0x40   :  { %v83_v57 = vld [vmem:[#allocation2 + $0xc0] sm:$0xff]  ;;  %v84_v1 = vld [vmem:[#allocation2 + $0xc8] sm:$0xff] }
  0x41   :  { %v85_v13 = vld [vmem:[#allocation2 + $0xd0] sm:$0xff]  ;;  %v86_v22 = vld [vmem:[#allocation2 + $0xd8] sm:$0xff] }
  0x42   :  { %481 = vmatmul.mubr.bf16.gmra.mrb[16].mxu0 %v1673_v33 }
  0x43   :  { %488 = vmatprep.mubr.bf16.mxu0 %v1674_v34  ;;  %v63_v34 = vld [vmem:[#allocation2 + $0x20] sm:$0xff] }
  0x4a   :  { %489 = vmatmul.mubr.bf16.gmra.mrb[20].mxu0 %v1676_v35 }
  0x4b   :  { %496 = vmatprep.mubr.bf16.mxu0 %v1677_v36  ;;  %v748_v36 = vld [vmem:[%s2145_s3] sm:$0xff] }
  0x52   :  { %497 = vmatmul.mubr.bf16.gmra.mrb[24].mxu0 %v1679_v37  ;;  %v749_v37 = vld [vmem:[%s2145_s3 + $0x8] sm:$0xff] }
  0x53   :  { %504 = vmatprep.mubr.bf16.mxu0 %v1680_v38 }
  0x5a   :  { %505 = vmatmul.mubr.bf16.gmra.mrb[28].mxu0 %v1682_v39 }
  0x5b   :  { %512 = vmatprep.mubr.bf16.mxu0 %v1683_v40 }
  0x62   :  { %513 = vmatmul.mubr.bf16.gmra.mrb[32].mxu0 %v1685_v41 }
  0x63   :  { %520 = vmatprep.mubr.bf16.mxu0 %v1686_v42  ;;  %v87_v42 = vld [vmem:[#allocation2 + $0xe0] sm:$0xff] }
  0x6a   :  { %521 = vmatmul.mubr.bf16.gmra.mrb[36].mxu0 %v1688_v43 }
  0x6b   :  { %528 = vmatprep.mubr.bf16.mxu0 %v1692_v44  ;;  %v64_v44 = vld [vmem:[#allocation2 + $0x28] sm:$0xff] }
  0x72   :  { %529 = vmatmul.mubr.bf16.gmra.mrb[40].mxu0 %v1694_v45 }
  0x73   :  { %536 = vmatprep.mubr.bf16.mxu0 %v1698_v46 }
  0x7a   :  { %537 = vmatmul.mubr.bf16.gmra.mrb[44].mxu0 %v1700_v48 }
  0xf5   :  { %v1473_v51 = vpop.f32.mrb[0].mxu0  ;;  %v1545_v54 = vpop.f32.mrb[0].mxu1 }
  0xf6   :  { %v1474_v53 = vpop.f32.mrb[1].mxu0  ;;  %v1546_v58 = vpop.f32.mrb[1].mxu1 }
  0xf7   :  { %v1475_v55 = vadd.f32 %v1474_v53, %v1473_v51  ;;  %v1476_v56 = vpop.f32.mrb[2].mxu0  ;;  %v1547_v61 = vadd.f32 %v1546_v58, %v1545_v54  ;;  %v1548_v62 = vpop.f32.mrb[2].mxu1 }
  0xf8   :  { %v1477_v60 = vpop.f32.mrb[3].mxu0  ;;  %v1549_v2 = vpop.f32.mrb[3].mxu1 }
  0xf9   :  { %v577_v63 = vadd.f32 %v1475_v55, %v59_v52  ;;  %v1478_v0 = vadd.f32 %v1477_v60, %v1476_v56  ;;  %v601_v3 = vadd.f32 %v1547_v61, %v83_v57  ;;  %v1550_v4 = vadd.f32 %v1549_v2, %v1548_v62  ;;  %v88_v52 = vld [vmem:[#allocation2 + $0xe8] sm:$0xff] }
  0xfb   :  { %610 = vst.msk [vmem:[#allocation2] sm:$0xff] %vm26_vm0, %v577_v63  ;;  %v578_v5 = vadd.f32 %v1478_v0, %v60_v59  ;;  %634 = vst.msk [vmem:[#allocation2 + $0xc0] sm:$0xff] %vm26_vm0, %v601_v3  ;;  %v602_v6 = vadd.f32 %v1550_v4, %v84_v1  ;;  %v65_v1 = vld [vmem:[#allocation2 + $0x30] sm:$0xff]  ;;  %v751_v4 = vld [vmem:[%s2145_s3 + $0x18] sm:$0xff] }
  0xfc   :  { %v750_v3 = vld [vmem:[%s2145_s3 + $0x10] sm:$0xff] }
  0xfd   :  { %611 = vst.msk [vmem:[#allocation2 + $0x8] sm:$0xff] %vm26_vm0, %v578_v5  ;;  %v1479_v7 = vpop.f32.mrb[4].mxu0  ;;  %635 = vst.msk [vmem:[#allocation2 + $0xc8] sm:$0xff] %vm26_vm0, %v602_v6  ;;  %v1551_v10 = vpop.f32.mrb[4].mxu1 }
  0xfe   :  { %v1480_v9 = vpop.f32.mrb[5].mxu0  ;;  %v1552_v14 = vpop.f32.mrb[5].mxu1 }
  0xff   :  { %v1481_v11 = vadd.f32 %v1480_v9, %v1479_v7  ;;  %v1482_v12 = vpop.f32.mrb[6].mxu0  ;;  %v1553_v18 = vadd.f32 %v1552_v14, %v1551_v10  ;;  %v1554_v19 = vpop.f32.mrb[6].mxu1  ;;  %v89_v9 = vld [vmem:[#allocation2 + $0xf0] sm:$0xff] }
 0x100   :  { %v1483_v16 = vpop.f32.mrb[7].mxu0  ;;  %v1555_v23 = vpop.f32.mrb[7].mxu1 }
 0x101   :  { %v579_v20 = vadd.f32 %v1481_v11, %v61_v8  ;;  %v1484_v21 = vadd.f32 %v1483_v16, %v1482_v12  ;;  %v603_v25 = vadd.f32 %v1553_v18, %v85_v13  ;;  %v1556_v26 = vadd.f32 %v1555_v23, %v1554_v19  ;;  %v66_v11 = vld [vmem:[#allocation2 + $0x38] sm:$0xff] }
 0x102   :  { %v645_v24 = vld [vmem:[#allocation2] sm:$0xff] }
 0x103   :  { %612 = vst.msk [vmem:[#allocation2 + $0x10] sm:$0xff] %vm26_vm0, %v579_v20  ;;  %v580_v27 = vadd.f32 %v1484_v21, %v62_v15  ;;  %v684_v28 = vadd.f32 %v1956_v17, %v645_v24  ;;  %636 = vst.msk [vmem:[#allocation2 + $0xd0] sm:$0xff] %vm26_vm0, %v603_v25  ;;  %v604_v30 = vadd.f32 %v1556_v26, %v86_v22  ;;  %v90_v20 = vld [vmem:[#allocation2 + $0xf8] sm:$0xff] }
 0x104   :  { %v646_v29 = vld [vmem:[#allocation2 + $0x8] sm:$0xff] }
 0x105   :  { %613 = vst.msk [vmem:[#allocation2 + $0x18] sm:$0xff] %vm26_vm0, %v580_v27  ;;  %v1485_v31 = vpop.f32.mrb[8].mxu0  ;;  %v685_v32 = vadd.f32 %v1956_v17, %v646_v29  ;;  %v716_v33 = vmax.f32 %v684_v28, 0.0  ;;  %637 = vst.msk [vmem:[#allocation2 + $0xd8] sm:$0xff] %vm26_vm0, %v604_v30  ;;  %v1557_v38 = vpop.f32.mrb[8].mxu1 }
 0x106   :  { %v1486_v35 = vpop.f32.mrb[9].mxu0  ;;  %v1558_v43 = vpop.f32.mrb[9].mxu1 }
 0x107   :  { %v1487_v39 = vadd.f32 %v1486_v35, %v1485_v31  ;;  %v1488_v40 = vpop.f32.mrb[10].mxu0  ;;  %v717_v41 = vmax.f32 %v685_v32, 0.0  ;;  %v1559_v46 = vadd.f32 %v1558_v43, %v1557_v38  ;;  %v1560_v47 = vpop.f32.mrb[10].mxu1  ;;  %v780_v50 = vmul.f32 %v748_v36, %v716_v33  ;;  %v67_v33 = vld [vmem:[#allocation2 + $0x40] sm:$0xff]  ;;  %v753_v36 = vld [vmem:[%s2145_s3 + $0x28] sm:$0xff] }
 0x108   :  { %v1489_v45 = vpop.f32.mrb[11].mxu0  ;;  %v1561_v53 = vpop.f32.mrb[11].mxu1  ;;  %v752_v35 = vld [vmem:[%s2145_s3 + $0x20] sm:$0xff] }
 0x109   :  { %v581_v48 = vadd.f32 %v1487_v39, %v63_v34  ;;  %v1490_v49 = vadd.f32 %v1489_v45, %v1488_v40  ;;  %v781_v51 = vmul.f32 %v749_v37, %v717_v41  ;;  %v605_v55 = vadd.f32 %v1559_v46, %v87_v42  ;;  %v68_v40 = vld [vmem:[#allocation2 + $0x48] sm:$0xff] }
 0x10a   :  { %v647_v54 = vld [vmem:[#allocation2 + $0x10] sm:$0xff]  ;;  %v1562_v56 = vadd.f32 %v1561_v53, %v1560_v47 }
 0x10b   :  { %614 = vst.msk [vmem:[#allocation2 + $0x20] sm:$0xff] %vm26_vm0, %v581_v48  ;;  %v582_v57 = vadd.f32 %v1490_v49, %v64_v44  ;;  %v812_v58 = vpack.c.bf16 %v781_v51, %v780_v50  ;;  %v686_v59 = vadd.f32 %v1956_v17, %v647_v54  ;;  %638 = vst.msk [vmem:[#allocation2 + $0xe0] sm:$0xff] %vm26_vm0, %v605_v55  ;;  %v69_v54 = vld [vmem:[#allocation2 + $0x50] sm:$0xff] }
 0x10c   :  { %v648_v60 = vld [vmem:[#allocation2 + $0x18] sm:$0xff]  ;;  %v606_v61 = vadd.f32 %v1562_v56, %v88_v52  ;;  %v754_v56 = vld [vmem:[%s2145_s3 + $0x30] sm:$0xff] }
 0x10d   :  { %615 = vst.msk [vmem:[#allocation2 + $0x28] sm:$0xff] %vm26_vm0, %v582_v57  ;;  %v1491_v62 = vpop.f32.mrb[12].mxu0  ;;  %1591 = vmatprep.mubr.msk.bf16.mxu1 %vm26_vm0, %v812_v58  ;;  %v687_v63 = vadd.f32 %v1956_v17, %v648_v60  ;;  %v718_v0 = vmax.f32 %v686_v59, 0.0  ;;  %v1563_v5 = vpop.f32.mrb[12].mxu1  ;;  %v755_v57 = vld [vmem:[%s2145_s3 + $0x38] sm:$0xff] }
 0x10e   :  { %v1492_v2 = vpop.f32.mrb[13].mxu0  ;;  %639 = vst.msk [vmem:[#allocation2 + $0xe8] sm:$0xff] %vm26_vm0, %v606_v61  ;;  %v1564_v10 = vpop.f32.mrb[13].mxu1  ;;  %v70_v61 = vld [vmem:[#allocation2 + $0x58] sm:$0xff] }
 0x10f   :  { %v1493_v6 = vadd.f32 %v1492_v2, %v1491_v62  ;;  %v1494_v7 = vpop.f32.mrb[14].mxu0  ;;  %v719_v8 = vmax.f32 %v687_v63, 0.0  ;;  %v1565_v13 = vadd.f32 %v1564_v10, %v1563_v5  ;;  %v1566_v14 = vpop.f32.mrb[14].mxu1  ;;  %v782_v18 = vmul.f32 %v750_v3, %v718_v0 }
 0x110   :  { %v1495_v12 = vpop.f32.mrb[15].mxu0  ;;  %v1567_v21 = vpop.f32.mrb[15].mxu1 }
 0x111   :  { %v583_v15 = vadd.f32 %v1493_v6, %v65_v1  ;;  %v1496_v16 = vadd.f32 %v1495_v12, %v1494_v7  ;;  %v783_v19 = vmul.f32 %v751_v4, %v719_v8  ;;  %v607_v23 = vadd.f32 %v1565_v13, %v89_v9  ;;  %v756_v13 = vld [vmem:[%s2145_s3 + $0x40] sm:$0xff] }
 0x112   :  { %v649_v22 = vld [vmem:[#allocation2 + $0x20] sm:$0xff]  ;;  %v1568_v24 = vadd.f32 %v1567_v21, %v1566_v14  ;;  %v757_v14 = vld [vmem:[%s2145_s3 + $0x48] sm:$0xff] }
 0x113   :  { %616 = vst.msk [vmem:[#allocation2 + $0x30] sm:$0xff] %vm26_vm0, %v583_v15  ;;  %v584_v25 = vadd.f32 %v1496_v16, %v66_v11  ;;  %v813_v26 = vpack.c.bf16 %v783_v19, %v782_v18  ;;  %v688_v27 = vadd.f32 %v1956_v17, %v649_v22  ;;  %640 = vst.msk [vmem:[#allocation2 + $0xf0] sm:$0xff] %vm26_vm0, %v607_v23  ;;  %v71_v11 = vld [vmem:[#allocation2 + $0x60] sm:$0xff]  ;;  %v72_v19 = vld [vmem:[#allocation2 + $0x68] sm:$0xff] }
 0x114   :  { %v650_v28 = vld [vmem:[#allocation2 + $0x28] sm:$0xff]  ;;  %v608_v29 = vadd.f32 %v1568_v24, %v90_v20 }
 0x115   :  { %617 = vst.msk [vmem:[#allocation2 + $0x38] sm:$0xff] %vm26_vm0, %v584_v25  ;;  %v1497_v30 = vpop.f32.mrb[16].mxu0  ;;  %1592 = vmatmul.mubr.msk.bf16.vlgmr.msra.gmra.mrb[16].mxu1 %vm26_vm0, %v813_v26  ;;  %v689_v31 = vadd.f32 %v1956_v17, %v650_v28  ;;  %v720_v32 = vmax.f32 %v688_v27, 0.0 }
 0x116   :  { %v1498_v34 = vpop.f32.mrb[17].mxu0  ;;  %641 = vst.msk [vmem:[#allocation2 + $0xf8] sm:$0xff] %vm26_vm0, %v608_v29 }
 0x117   :  { %v1499_v37 = vadd.f32 %v1498_v34, %v1497_v30  ;;  %v1500_v38 = vpop.f32.mrb[18].mxu0  ;;  %v721_v39 = vmax.f32 %v689_v31, 0.0  ;;  %v784_v44 = vmul.f32 %v752_v35, %v720_v32  ;;  %v758_v35 = vld [vmem:[%s2145_s3 + $0x50] sm:$0xff] }
 0x118   :  { %v1501_v41 = vpop.f32.mrb[19].mxu0 }
 0x119   :  { %v585_v42 = vadd.f32 %v1499_v37, %v67_v33  ;;  %v1502_v43 = vadd.f32 %v1501_v41, %v1500_v38  ;;  %v785_v45 = vmul.f32 %v753_v36, %v721_v39  ;;  %v73_v33 = vld [vmem:[#allocation2 + $0x70] sm:$0xff]  ;;  %v759_v36 = vld [vmem:[%s2145_s3 + $0x58] sm:$0xff] }
 0x11a   :  { %v651_v46 = vld [vmem:[#allocation2 + $0x30] sm:$0xff] }
 0x11b   :  { %618 = vst.msk [vmem:[#allocation2 + $0x40] sm:$0xff] %vm26_vm0, %v585_v42  ;;  %v586_v47 = vadd.f32 %v1502_v43, %v68_v40  ;;  %v814_v48 = vpack.c.bf16 %v785_v45, %v784_v44  ;;  %v690_v49 = vadd.f32 %v1956_v17, %v651_v46  ;;  %v74_v40 = vld [vmem:[#allocation2 + $0x78] sm:$0xff] }
 0x11c   :  { %v652_v50 = vld [vmem:[#allocation2 + $0x38] sm:$0xff] }
 0x11d   :  { %619 = vst.msk [vmem:[#allocation2 + $0x48] sm:$0xff] %vm26_vm0, %v586_v47  ;;  %v1503_v51 = vpop.f32.mrb[20].mxu0  ;;  %1595 = vmatprep.mubr.msk.bf16.mxu1 %vm26_vm0, %v814_v48  ;;  %v691_v52 = vadd.f32 %v1956_v17, %v652_v50  ;;  %v722_v53 = vmax.f32 %v690_v49, 0.0 }
 0x11e   :  { %v1504_v55 = vpop.f32.mrb[21].mxu0 }
 0x11f   :  { %v1505_v58 = vadd.f32 %v1504_v55, %v1503_v51  ;;  %v1506_v59 = vpop.f32.mrb[22].mxu0  ;;  %v723_v60 = vmax.f32 %v691_v52, 0.0  ;;  %v786_v1 = vmul.f32 %v754_v56, %v722_v53  ;;  %v760_v56 = vld [vmem:[%s2145_s3 + $0x60] sm:$0xff] }
 0x120   :  { %v1507_v62 = vpop.f32.mrb[23].mxu0 }
 0x121   :  { %v587_v63 = vadd.f32 %v1505_v58, %v69_v54  ;;  %v1508_v0 = vadd.f32 %v1507_v62, %v1506_v59  ;;  %v787_v2 = vmul.f32 %v755_v57, %v723_v60  ;;  %v75_v54 = vld [vmem:[#allocation2 + $0x80] sm:$0xff]  ;;  %v761_v57 = vld [vmem:[%s2145_s3 + $0x68] sm:$0xff] }
 0x122   :  { %v653_v3 = vld [vmem:[#allocation2 + $0x40] sm:$0xff] }
 0x123   :  { %620 = vst.msk [vmem:[#allocation2 + $0x50] sm:$0xff] %vm26_vm0, %v587_v63  ;;  %v588_v4 = vadd.f32 %v1508_v0, %v70_v61  ;;  %v815_v5 = vpack.c.bf16 %v787_v2, %v786_v1  ;;  %v692_v6 = vadd.f32 %v1956_v17, %v653_v3  ;;  %v76_v61 = vld [vmem:[#allocation2 + $0x88] sm:$0xff] }
 0x124   :  { %v654_v7 = vld [vmem:[#allocation2 + $0x48] sm:$0xff] }
 0x125   :  { %621 = vst.msk [vmem:[#allocation2 + $0x58] sm:$0xff] %vm26_vm0, %v588_v4  ;;  %v1509_v8 = vpop.f32.mrb[24].mxu0  ;;  %1596 = vmatmul.mubr.msk.bf16.gmra.mrb[20].mxu1 %vm26_vm0, %v815_v5  ;;  %v693_v9 = vadd.f32 %v1956_v17, %v654_v7  ;;  %v724_v10 = vmax.f32 %v692_v6, 0.0 }
 0x126   :  { %v1510_v12 = vpop.f32.mrb[25].mxu0 }
 0x127   :  { %v1511_v15 = vadd.f32 %v1510_v12, %v1509_v8  ;;  %v1512_v16 = vpop.f32.mrb[26].mxu0  ;;  %v725_v18 = vmax.f32 %v693_v9, 0.0  ;;  %v788_v23 = vmul.f32 %v756_v13, %v724_v10  ;;  %v762_v13 = vld [vmem:[%s2145_s3 + $0x70] sm:$0xff] }
 0x128   :  { %v1513_v20 = vpop.f32.mrb[27].mxu0 }
 0x129   :  { %v589_v21 = vadd.f32 %v1511_v15, %v71_v11  ;;  %v1514_v22 = vadd.f32 %v1513_v20, %v1512_v16  ;;  %v789_v24 = vmul.f32 %v757_v14, %v725_v18  ;;  %v77_v11 = vld [vmem:[#allocation2 + $0x90] sm:$0xff]  ;;  %v763_v14 = vld [vmem:[%s2145_s3 + $0x78] sm:$0xff] }
 0x12a   :  { %v655_v25 = vld [vmem:[#allocation2 + $0x50] sm:$0xff] }
 0x12b   :  { %622 = vst.msk [vmem:[#allocation2 + $0x60] sm:$0xff] %vm26_vm0, %v589_v21  ;;  %v590_v26 = vadd.f32 %v1514_v22, %v72_v19  ;;  %v816_v27 = vpack.c.bf16 %v789_v24, %v788_v23  ;;  %v694_v28 = vadd.f32 %v1956_v17, %v655_v25  ;;  %v78_v19 = vld [vmem:[#allocation2 + $0x98] sm:$0xff] }
 0x12c   :  { %v656_v29 = vld [vmem:[#allocation2 + $0x58] sm:$0xff] }
 0x12d   :  { %623 = vst.msk [vmem:[#allocation2 + $0x68] sm:$0xff] %vm26_vm0, %v590_v26  ;;  %v1515_v30 = vpop.f32.mrb[28].mxu0  ;;  %1599 = vmatprep.mubr.msk.bf16.mxu1 %vm26_vm0, %v816_v27  ;;  %v695_v31 = vadd.f32 %v1956_v17, %v656_v29  ;;  %v726_v32 = vmax.f32 %v694_v28, 0.0 }
 0x12e   :  { %v1516_v34 = vpop.f32.mrb[29].mxu0 }
 0x12f   :  { %v1517_v37 = vadd.f32 %v1516_v34, %v1515_v30  ;;  %v1518_v38 = vpop.f32.mrb[30].mxu0  ;;  %v727_v39 = vmax.f32 %v695_v31, 0.0  ;;  %v790_v44 = vmul.f32 %v758_v35, %v726_v32  ;;  %v764_v35 = vld [vmem:[%s2145_s3 + $0x80] sm:$0xff] }
 0x130   :  { %v1519_v41 = vpop.f32.mrb[31].mxu0 }
 0x131   :  { %v591_v42 = vadd.f32 %v1517_v37, %v73_v33  ;;  %v1520_v43 = vadd.f32 %v1519_v41, %v1518_v38  ;;  %v791_v45 = vmul.f32 %v759_v36, %v727_v39  ;;  %v79_v33 = vld [vmem:[#allocation2 + $0xa0] sm:$0xff]  ;;  %v765_v36 = vld [vmem:[%s2145_s3 + $0x88] sm:$0xff] }
 0x132   :  { %v657_v46 = vld [vmem:[#allocation2 + $0x60] sm:$0xff] }
 0x133   :  { %624 = vst.msk [vmem:[#allocation2 + $0x70] sm:$0xff] %vm26_vm0, %v591_v42  ;;  %v592_v47 = vadd.f32 %v1520_v43, %v74_v40  ;;  %v817_v48 = vpack.c.bf16 %v791_v45, %v790_v44  ;;  %v696_v49 = vadd.f32 %v1956_v17, %v657_v46  ;;  %v80_v40 = vld [vmem:[#allocation2 + $0xa8] sm:$0xff] }
 0x134   :  { %v658_v50 = vld [vmem:[#allocation2 + $0x68] sm:$0xff] }
 0x135   :  { %625 = vst.msk [vmem:[#allocation2 + $0x78] sm:$0xff] %vm26_vm0, %v592_v47  ;;  %v1521_v51 = vpop.f32.mrb[32].mxu0  ;;  %1600 = vmatmul.mubr.msk.bf16.gmra.mrb[24].mxu1 %vm26_vm0, %v817_v48  ;;  %v697_v52 = vadd.f32 %v1956_v17, %v658_v50  ;;  %v728_v53 = vmax.f32 %v696_v49, 0.0 }
 0x136   :  { %v1522_v55 = vpop.f32.mrb[33].mxu0 }
 0x137   :  { %v1523_v58 = vadd.f32 %v1522_v55, %v1521_v51  ;;  %v1524_v59 = vpop.f32.mrb[34].mxu0  ;;  %v729_v60 = vmax.f32 %v697_v52, 0.0  ;;  %v792_v1 = vmul.f32 %v760_v56, %v728_v53  ;;  %v766_v56 = vld [vmem:[%s2145_s3 + $0x90] sm:$0xff] }
 0x138   :  { %v1525_v62 = vpop.f32.mrb[35].mxu0 }
 0x139   :  { %v593_v63 = vadd.f32 %v1523_v58, %v75_v54  ;;  %v1526_v0 = vadd.f32 %v1525_v62, %v1524_v59  ;;  %v793_v2 = vmul.f32 %v761_v57, %v729_v60  ;;  %v81_v54 = vld [vmem:[#allocation2 + $0xb0] sm:$0xff]  ;;  %v767_v57 = vld [vmem:[%s2145_s3 + $0x98] sm:$0xff] }
 0x13a   :  { %v659_v3 = vld [vmem:[#allocation2 + $0x70] sm:$0xff] }
 0x13b   :  { %626 = vst.msk [vmem:[#allocation2 + $0x80] sm:$0xff] %vm26_vm0, %v593_v63  ;;  %v594_v4 = vadd.f32 %v1526_v0, %v76_v61  ;;  %v818_v5 = vpack.c.bf16 %v793_v2, %v792_v1  ;;  %v698_v6 = vadd.f32 %v1956_v17, %v659_v3  ;;  %v82_v61 = vld [vmem:[#allocation2 + $0xb8] sm:$0xff] }
 0x13c   :  { %v660_v7 = vld [vmem:[#allocation2 + $0x78] sm:$0xff] }
 0x13d   :  { %627 = vst.msk [vmem:[#allocation2 + $0x88] sm:$0xff] %vm26_vm0, %v594_v4  ;;  %v1527_v8 = vpop.f32.mrb[36].mxu0  ;;  %1603 = vmatprep.mubr.msk.bf16.mxu1 %vm26_vm0, %v818_v5  ;;  %v699_v9 = vadd.f32 %v1956_v17, %v660_v7  ;;  %v730_v10 = vmax.f32 %v698_v6, 0.0 }
 0x13e   :  { %v1528_v12 = vpop.f32.mrb[37].mxu0 }
 0x13f   :  { %v1529_v15 = vadd.f32 %v1528_v12, %v1527_v8  ;;  %v1530_v16 = vpop.f32.mrb[38].mxu0  ;;  %v731_v18 = vmax.f32 %v699_v9, 0.0  ;;  %v794_v23 = vmul.f32 %v762_v13, %v730_v10  ;;  %v669_v10 = vld [vmem:[#allocation2 + $0xc0] sm:$0xff]  ;;  %v769_v13 = vld [vmem:[%s2145_s3 + $0xa8] sm:$0xff] }
 0x140   :  { %v1531_v20 = vpop.f32.mrb[39].mxu0  ;;  %v768_v12 = vld [vmem:[%s2145_s3 + $0xa0] sm:$0xff] }
 0x141   :  { %v595_v21 = vadd.f32 %v1529_v15, %v77_v11  ;;  %v1532_v22 = vadd.f32 %v1531_v20, %v1530_v16  ;;  %v795_v24 = vmul.f32 %v763_v14, %v731_v18  ;;  %v670_v11 = vld [vmem:[#allocation2 + $0xc8] sm:$0xff]  ;;  %v708_v15 = vadd.f32 %v1956_v17, %v669_v10 }
 0x142   :  { %v661_v25 = vld [vmem:[#allocation2 + $0x80] sm:$0xff]  ;;  %v709_v16 = vadd.f32 %v1956_v17, %v670_v11 }
 0x143   :  { %628 = vst.msk [vmem:[#allocation2 + $0x90] sm:$0xff] %vm26_vm0, %v595_v21  ;;  %v596_v26 = vadd.f32 %v1532_v22, %v78_v19  ;;  %v819_v27 = vpack.c.bf16 %v795_v24, %v794_v23  ;;  %v700_v28 = vadd.f32 %v1956_v17, %v661_v25  ;;  %v772_v23 = vld [vmem:[%s2145_s3 + $0xc0] sm:$0xff]  ;;  %v740_v25 = vmax.f32 %v708_v15, 0.0 }
 0x144   :  { %v662_v29 = vld [vmem:[#allocation2 + $0x88] sm:$0xff] }
 0x145   :  { %629 = vst.msk [vmem:[#allocation2 + $0x98] sm:$0xff] %vm26_vm0, %v596_v26  ;;  %v1533_v30 = vpop.f32.mrb[40].mxu0  ;;  %1604 = vmatmul.mubr.msk.bf16.gmra.mrb[28].mxu1 %vm26_vm0, %v819_v27  ;;  %v701_v31 = vadd.f32 %v1956_v17, %v662_v29  ;;  %v732_v32 = vmax.f32 %v700_v28, 0.0  ;;  %v741_v26 = vmax.f32 %v709_v16, 0.0  ;;  %v671_v27 = vld [vmem:[#allocation2 + $0xd0] sm:$0xff]  ;;  %v672_v28 = vld [vmem:[#allocation2 + $0xd8] sm:$0xff] }
 0x146   :  { %v1534_v34 = vpop.f32.mrb[41].mxu0 }
 0x147   :  { %v1535_v37 = vadd.f32 %v1534_v34, %v1533_v30  ;;  %v1536_v38 = vpop.f32.mrb[42].mxu0  ;;  %v733_v39 = vmax.f32 %v701_v31, 0.0  ;;  %v796_v44 = vmul.f32 %v764_v35, %v732_v32  ;;  %v773_v31 = vld [vmem:[%s2145_s3 + $0xc8] sm:$0xff]  ;;  %v673_v32 = vld [vmem:[#allocation2 + $0xe0] sm:$0xff]  ;;  %v770_v34 = vld [vmem:[%s2145_s3 + $0xb0] sm:$0xff] }
 0x148   :  { %v1537_v41 = vpop.f32.mrb[43].mxu0  ;;  %v771_v35 = vld [vmem:[%s2145_s3 + $0xb8] sm:$0xff] }
 0x149   :  { %v597_v42 = vadd.f32 %v1535_v37, %v79_v33  ;;  %v1538_v43 = vadd.f32 %v1537_v41, %v1536_v38  ;;  %v797_v45 = vmul.f32 %v765_v36, %v733_v39  ;;  %v674_v33 = vld [vmem:[#allocation2 + $0xe8] sm:$0xff]  ;;  %v710_v37 = vadd.f32 %v1956_v17, %v671_v27 }
 0x14a   :  { %v663_v46 = vld [vmem:[#allocation2 + $0x90] sm:$0xff]  ;;  %v711_v38 = vadd.f32 %v1956_v17, %v672_v28  ;;  %v804_v39 = vmul.f32 %v772_v23, %v740_v25  ;;  %v712_v41 = vadd.f32 %v1956_v17, %v673_v32 }
 0x14b   :  { %630 = vst.msk [vmem:[#allocation2 + $0xa0] sm:$0xff] %vm26_vm0, %v597_v42  ;;  %v598_v47 = vadd.f32 %v1538_v43, %v80_v40  ;;  %v820_v48 = vpack.c.bf16 %v797_v45, %v796_v44  ;;  %v702_v49 = vadd.f32 %v1956_v17, %v663_v46  ;;  %v805_v40 = vmul.f32 %v773_v31, %v741_v26 }
 0x14c   :  { %v664_v50 = vld [vmem:[#allocation2 + $0x98] sm:$0xff]  ;;  %v713_v42 = vadd.f32 %v1956_v17, %v674_v33  ;;  %v742_v46 = vmax.f32 %v710_v37, 0.0 }
 0x14d   :  { %631 = vst.msk [vmem:[#allocation2 + $0xa8] sm:$0xff] %vm26_vm0, %v598_v47  ;;  %v1539_v51 = vpop.f32.mrb[44].mxu0  ;;  %1607 = vmatprep.mubr.msk.bf16.mxu1 %vm26_vm0, %v820_v48  ;;  %v703_v52 = vadd.f32 %v1956_v17, %v664_v50  ;;  %v734_v53 = vmax.f32 %v702_v49, 0.0  ;;  %v743_v47 = vmax.f32 %v711_v38, 0.0  ;;  %v774_v48 = vld [vmem:[%s2145_s3 + $0xd0] sm:$0xff]  ;;  %v824_v49 = vpack.c.bf16 %v805_v40, %v804_v39  ;;  %v775_v50 = vld [vmem:[%s2145_s3 + $0xd8] sm:$0xff] }
 0x14e   :  { %v1540_v55 = vpop.f32.mrb[45].mxu0 }
 0x14f   :  { %v1541_v58 = vadd.f32 %v1540_v55, %v1539_v51  ;;  %v1542_v59 = vpop.f32.mrb[46].mxu0  ;;  %v735_v60 = vmax.f32 %v703_v52, 0.0  ;;  %v798_v1 = vmul.f32 %v766_v56, %v734_v53  ;;  %v744_v51 = vmax.f32 %v712_v41, 0.0  ;;  %v675_v53 = vld [vmem:[#allocation2 + $0xf0] sm:$0xff]  ;;  %v776_v55 = vld [vmem:[%s2145_s3 + $0xe0] sm:$0xff]  ;;  %v777_v56 = vld [vmem:[%s2145_s3 + $0xe8] sm:$0xff] }
 0x150   :  { %v1543_v62 = vpop.f32.mrb[47].mxu0  ;;  %v745_v52 = vmax.f32 %v713_v42, 0.0 }
 0x151   :  { %v599_v63 = vadd.f32 %v1541_v58, %v81_v54  ;;  %v1544_v0 = vadd.f32 %v1543_v62, %v1542_v59  ;;  %v799_v2 = vmul.f32 %v767_v57, %v735_v60  ;;  %v676_v54 = vld [vmem:[#allocation2 + $0xf8] sm:$0xff]  ;;  %v806_v57 = vmul.f32 %v774_v48, %v742_v46 }
 0x152   :  { %v665_v3 = vld [vmem:[#allocation2 + $0xa0] sm:$0xff]  ;;  %v807_v58 = vmul.f32 %v775_v50, %v743_v47  ;;  %v714_v59 = vadd.f32 %v1956_v17, %v675_v53  ;;  %v715_v60 = vadd.f32 %v1956_v17, %v676_v54  ;;  %v809_v62 = vmul.f32 %v777_v56, %v745_v52 }
 0x153   :  { %632 = vst.msk [vmem:[#allocation2 + $0xb0] sm:$0xff] %vm26_vm0, %v599_v63  ;;  %v600_v4 = vadd.f32 %v1544_v0, %v82_v61  ;;  %v821_v5 = vpack.c.bf16 %v799_v2, %v798_v1  ;;  %v704_v6 = vadd.f32 %v1956_v17, %v665_v3  ;;  %v808_v61 = vmul.f32 %v776_v55, %v744_v51  ;;  %v778_v3 = vld [vmem:[%s2145_s3 + $0xf0] sm:$0xff] }
 0x154   :  { %v666_v7 = vld [vmem:[#allocation2 + $0xa8] sm:$0xff]  ;;  %v825_v63 = vpack.c.bf16 %v807_v58, %v806_v57  ;;  %v746_v0 = vmax.f32 %v714_v59, 0.0  ;;  %v747_v1 = vmax.f32 %v715_v60, 0.0 }
 0x155   :  { %633 = vst.msk [vmem:[#allocation2 + $0xb8] sm:$0xff] %vm26_vm0, %v600_v4  ;;  %1608 = vmatmul.mubr.msk.bf16.gmra.mrb[32].mxu1 %vm26_vm0, %v821_v5  ;;  %v705_v8 = vadd.f32 %v1956_v17, %v666_v7  ;;  %v736_v9 = vmax.f32 %v704_v6, 0.0  ;;  %v826_v2 = vpack.c.bf16 %v809_v62, %v808_v61  ;;  %v779_v4 = vld [vmem:[%s2145_s3 + $0xf8] sm:$0xff]  ;;  %s1734_s3 = smov [#allocation3]  }
 0x156   :  { %v810_v5 = vmul.f32 %v778_v3, %v746_v0  ;;  %s1218_s20 = sshll.u32 %s1734_s3, 4  ;;  %s1219_s20 = int_to_ptr.vmem [resolvable:$true] %s1218_s20 }
 0x157   :  { %v737_v14 = vmax.f32 %v705_v8, 0.0  ;;  %v800_v18 = vmul.f32 %v768_v12, %v736_v9  ;;  %s1709_s21 = scalar_lea.vmem %s1219_s20, 2048  ;;  %p1714_p1 = scmp.lt.s32.totalorder %s1219_s20, %s1219_s20 }
 0x158   :  { %p1710_p0 = scmp.ne.s32.totalorder %s1219_s20, %s1709_s21  ;;  %p1715_p2 = scmp.lt.s32.totalorder %s1709_s21, %s1709_s21 }
 0x159   :  { %v801_v19 = vmul.f32 %v769_v13, %v737_v14 }
 0x15a   :  { %v667_v20 = vld [vmem:[#allocation2 + $0xb0] sm:$0xff]  ;;  %p1716_p3 = por %p1715_p2, %p1714_p1 }
 0x15b   :  { %v822_v21 = vpack.c.bf16 %v801_v19, %v800_v18  ;;  %v706_v22 = vadd.f32 %v1956_v17, %v667_v20 }
 0x15c   :  { %v668_v24 = vld [vmem:[#allocation2 + $0xb8] sm:$0xff]  ;;  %p1717_p4 = pnand %p1716_p3, %p1710_p0 }
 0x15d   :  { %1611 = vmatprep.mubr.msk.bf16.mxu1 %vm26_vm0, %v822_v21  ;;  %v707_v29 = vadd.f32 %v1956_v17, %v668_v24  ;;  %v738_v30 = vmax.f32 %v706_v22, 0.0  ;;  %v811_v17 = vmul.f32 %v779_v4, %v747_v1 }
 0x15f   :  { %v739_v36 = vmax.f32 %v707_v29, 0.0  ;;  %v802_v43 = vmul.f32 %v770_v34, %v738_v30  ;;  %v827_v6 = vpack.c.bf16 %v811_v17, %v810_v5 }
 0x161   :  { %v803_v44 = vmul.f32 %v771_v35, %v739_v36 }
 0x163   :  { %v823_v45 = vpack.c.bf16 %v803_v44, %v802_v43 }
 0x165   :  { %1612 = vmatmul.mubr.msk.bf16.gmra.mrb[36].mxu1 %vm26_vm0, %v823_v45 }
 0x166   :  { %1615 = vmatprep.mubr.msk.bf16.mxu1 %vm26_vm0, %v824_v49 }
 0x16d   :  { %1616 = vmatmul.mubr.msk.bf16.gmra.mrb[40].mxu1 %vm26_vm0, %v825_v63 }
 0x16e   :  { %1619 = vmatprep.mubr.msk.bf16.mxu1 %vm26_vm0, %v826_v2 }
 0x175   :  { %1620 = vmatmul.mubr.msk.bf16.gmra.mrb[44].mxu1 %vm26_vm0, %v827_v6 }
 0x1e8   :  { %v1593_v7 = vpop.f32.mrb[16].mxu1 }
 0x1e9   :  { %v926_v8 = vpop.f32.mrb[17].mxu1 }
 0x1ea   :  { %v1594_v9 = vpop.f32.mrb[18].mxu1 }
 0x1eb   :  { %v1370_v10 = vpack.c.bf16 %v1594_v9, %v1593_v7  ;;  %v929_v11 = vpop.f32.mrb[19].mxu1 }
 0x1ec   :  { %v1365_v12 = vpack.c.bf16 %v929_v11, %v926_v8 }
 0x1ed   :  { %1442 = vst [vmem:[#allocation3 + $0x8] sm:$0xff] %v1370_v10  }
 0x1ee   :  { %1366 = vst [vmem:[#allocation3] sm:$0xff] %v1365_v12  }
 0x1f8   :  { %v1597_v13 = vpop.f32.mrb[20].mxu1 }
 0x1f9   :  { %v942_v14 = vpop.f32.mrb[21].mxu1 }
 0x1fa   :  { %v1598_v15 = vpop.f32.mrb[22].mxu1 }
 0x1fb   :  { %v1380_v16 = vpack.c.bf16 %v1598_v15, %v1597_v13  ;;  %v945_v18 = vpop.f32.mrb[23].mxu1 }
 0x1fc   :  { %v1375_v19 = vpack.c.bf16 %v945_v18, %v942_v14 }
 0x1fd   :  { %1444 = vst [vmem:[#allocation3 + $0x18] sm:$0xff] %v1380_v16  }
 0x1fe   :  { %1443 = vst [vmem:[#allocation3 + $0x10] sm:$0xff] %v1375_v19  }
 0x208   :  { %v1601_v20 = vpop.f32.mrb[24].mxu1 }
 0x209   :  { %v958_v21 = vpop.f32.mrb[25].mxu1 }
 0x20a   :  { %v1602_v22 = vpop.f32.mrb[26].mxu1 }
 0x20b   :  { %v1390_v23 = vpack.c.bf16 %v1602_v22, %v1601_v20  ;;  %v961_v24 = vpop.f32.mrb[27].mxu1 }
 0x20c   :  { %v1385_v25 = vpack.c.bf16 %v961_v24, %v958_v21 }
 0x20d   :  { %1446 = vst [vmem:[#allocation3 + $0x28] sm:$0xff] %v1390_v23  }
 0x20e   :  { %1445 = vst [vmem:[#allocation3 + $0x20] sm:$0xff] %v1385_v25  }
 0x218   :  { %v1605_v26 = vpop.f32.mrb[28].mxu1 }
 0x219   :  { %v974_v27 = vpop.f32.mrb[29].mxu1 }
 0x21a   :  { %v1606_v28 = vpop.f32.mrb[30].mxu1 }
 0x21b   :  { %v1400_v29 = vpack.c.bf16 %v1606_v28, %v1605_v26  ;;  %v977_v30 = vpop.f32.mrb[31].mxu1 }
 0x21c   :  { %v1395_v31 = vpack.c.bf16 %v977_v30, %v974_v27 }
 0x21d   :  { %1448 = vst [vmem:[#allocation3 + $0x38] sm:$0xff] %v1400_v29  }
 0x21e   :  { %1447 = vst [vmem:[#allocation3 + $0x30] sm:$0xff] %v1395_v31  }
 0x228   :  { %v1609_v32 = vpop.f32.mrb[32].mxu1 }
 0x229   :  { %v990_v33 = vpop.f32.mrb[33].mxu1 }
 0x22a   :  { %v1610_v34 = vpop.f32.mrb[34].mxu1 }
 0x22b   :  { %v1410_v35 = vpack.c.bf16 %v1610_v34, %v1609_v32  ;;  %v993_v36 = vpop.f32.mrb[35].mxu1 }
 0x22c   :  { %v1405_v37 = vpack.c.bf16 %v993_v36, %v990_v33 }
 0x22d   :  { %1450 = vst [vmem:[#allocation3 + $0x48] sm:$0xff] %v1410_v35  }
 0x22e   :  { %1449 = vst [vmem:[#allocation3 + $0x40] sm:$0xff] %v1405_v37  }
 0x238   :  { %v1613_v38 = vpop.f32.mrb[36].mxu1 }
 0x239   :  { %v1006_v39 = vpop.f32.mrb[37].mxu1 }
 0x23a   :  { %v1614_v40 = vpop.f32.mrb[38].mxu1 }
 0x23b   :  { %v1420_v41 = vpack.c.bf16 %v1614_v40, %v1613_v38  ;;  %v1009_v42 = vpop.f32.mrb[39].mxu1 }
 0x23c   :  { %v1415_v43 = vpack.c.bf16 %v1009_v42, %v1006_v39 }
 0x23d   :  { %1452 = vst [vmem:[#allocation3 + $0x58] sm:$0xff] %v1420_v41  }
 0x23e   :  { %1451 = vst [vmem:[#allocation3 + $0x50] sm:$0xff] %v1415_v43  }
 0x240   :  { %v1617_v44 = vpop.f32.mrb[40].mxu1 }
 0x241   :  { %v1022_v45 = vpop.f32.mrb[41].mxu1 }
 0x242   :  { %v1618_v46 = vpop.f32.mrb[42].mxu1 }
 0x243   :  { %v1430_v47 = vpack.c.bf16 %v1618_v46, %v1617_v44  ;;  %v1025_v48 = vpop.f32.mrb[43].mxu1 }
 0x244   :  { %v1425_v49 = vpack.c.bf16 %v1025_v48, %v1022_v45 }
 0x245   :  { %1454 = vst [vmem:[#allocation3 + $0x68] sm:$0xff] %v1430_v47  }
 0x246   :  { %1453 = vst [vmem:[#allocation3 + $0x60] sm:$0xff] %v1425_v49  }
 0x248   :  { %v1621_v50 = vpop.f32.mrb[44].mxu1 }
 0x249   :  { %v1038_v51 = vpop.f32.mrb[45].mxu1 }
 0x24a   :  { %v1622_v52 = vpop.f32.mrb[46].mxu1 }
 0x24b   :  { %v1440_v53 = vpack.c.bf16 %v1622_v52, %v1621_v50  ;;  %v1041_v54 = vpop.f32.mrb[47].mxu1 }
 0x24c   :  { %v1435_v55 = vpack.c.bf16 %v1041_v54, %v1038_v51 }
 0x24d   :  { %1456 = vst [vmem:[#allocation3 + $0x78] sm:$0xff] %v1440_v53  }
 0x24e   :  { %1455 = vst [vmem:[#allocation3 + $0x70] sm:$0xff] %v1435_v55  }
 0x24f   :  { %1720 = shalt.err (!%p1717_p4)
}
 0x250   :  { %s1721_s24 = scalar_lea.hbm %s2147_s5, 2048 }
 0x251   :  { %p1722_p5 = scmp.ne.s32.totalorder %s2147_s5, %s1721_s24  ;;  %p1725_p6 = scmp.lt.u32.totalorder %s1721_s24, %s2147_s5 }
 0x253   :  { %p1727_p7 = pnand %p1725_p6, %p1722_p5 }
 0x255   :  { %1730 = shalt.err (!%p1727_p7)
}
 0x256   :  { %s1735_s29 = smov 64   ;;  %s1736_s30 = smov 4  }
 0x257   :  { %1224 = dma.vmem_to_hbm [thread:$0]  %s1219_s20, 2048, %s2147_s5, [#allocation4], %s1735_s29, %s1735_s29, %s1736_s30  }
 0x258   :  { %1731 = dma.done.wait [#allocation4], 2048  }
 0x259   :  { %1732 = vsyncadd [#allocation4], 4294965248 }
 0x25a   :  { %1228 = vsyncpa [#allocation4], 1 }

</bundles_post_ra>
